<compile_context>
chip_gen: v6e
topology: v6e:2x2x1
jax: 0.10.0
libtpu: 0.0.40
codegen_flags: <defaults>
</compile_context>

<pallas_src>
import jax
import jax.numpy as jnp
from jax.experimental import pallas as pl
from jax.experimental.pallas import tpu as pltpu


def _make_cnn_kernel(C, use_mxu):
    def kernel(x1_ref, x2_ref, w1_ref, w2_ref, out_ref):
        # x1_ref : (C, TH2, 2*W1) paired-row view of the full-res input
        #          (lane k of half-res row h2 holds x1[c, 2*h2 + k//W1, k%W1])
        # x2_ref : (C, TH2, W2)   half-res input
        # w*_ref : (C, C) = (Cout, Cin); SMEM f32 (VPU path) or VMEM (MXU path)
        # out_ref: (C, TH2, 2*W1) paired-row view of the output
        _, th2, l1 = x1_ref.shape
        w2_dim = x2_ref.shape[-1]

        x1 = x1_ref[...]
        x2 = x2_ref[...]

        if use_mxu:
            # (C, C) @ (C, TH*L) on the MXU for non-tiny channel counts.
            y1 = jnp.dot(
                w1_ref[...], x1.reshape(C, th2 * l1),
                preferred_element_type=jnp.float32,
            ).reshape(C, th2, l1)
            y2 = jnp.dot(
                w2_ref[...], x2.reshape(C, th2 * w2_dim),
                preferred_element_type=jnp.float32,
            ).reshape(C, th2, w2_dim)
        else:
            # Tiny C: unrolled scalar-broadcast MACs on the VPU; each weight is
            # a cheap scalar load from SMEM, the MXU stays idle (memory-bound).
            rows1 = []
            rows2 = []
            for co in range(C):
                acc1 = w1_ref[co, 0] * x1[0:1]
                acc2 = w2_ref[co, 0] * x2[0:1]
                for ci in range(1, C):
                    acc1 = acc1 + w1_ref[co, ci] * x1[ci:ci + 1]
                    acc2 = acc2 + w2_ref[co, ci] * x2[ci:ci + 1]
                rows1.append(acc1)
                rows2.append(acc2)
            y1 = jnp.concatenate(rows1, axis=0)   # (C, TH2, 2*W1), f32
            y2 = jnp.concatenate(rows2, axis=0)   # (C, TH2, W2),  f32

        # Nearest-neighbour 2x upsample fused with the add:
        #   * W-duplication: lane interleave on the quarter-size tensor only.
        #   * H-duplication: the two duplicated rows are the two W1-lane halves
        #     of one paired output row -> a lane concat, no sublane relayout.
        y2w = jnp.broadcast_to(
            y2[:, :, :, None], (C, th2, w2_dim, 2)
        ).reshape(C, th2, 2 * w2_dim)                  # (C, TH2, W1)
        y2_up = jnp.concatenate([y2w, y2w], axis=-1)   # (C, TH2, 2*W1)

        out_ref[...] = (y1 + y2_up).astype(out_ref.dtype)

    return kernel


def _pick_row_block(h2, c, w1_width, w2_width, itemsize,
                    budget_bytes=8 * 1024 * 1024):
    """Largest half-res row block whose double-buffered working set stays under
    `budget_bytes`.  Must be a multiple of 8 unless it equals the full height
    (the (8,128) block constraint only applies to partial blocks)."""
    per_row = 2 * c * itemsize * (2 * w1_width + 2 * w1_width + w2_width)
    max_rows = max(1, budget_bytes // max(1, per_row))
    if h2 <= max_rows:
        return h2
    best = h2  # fallback: full height (always correct)
    t = 8
    while t <= max_rows:
        if h2 % t == 0:
            best = t
        t += 8
    return best


def cnn_forward(x1_nchw, x2_nchw, w1, w2):
    """x1: (N, C, H1, W1); x2: (N, C, H1//2, W1//2); w1, w2: (C, C, 1, 1).

    Computes conv1(x1) + upsample_nearest_2x(conv2(x2)), NCHW in / NCHW out.
    """
    N, C, H1, W1 = x1_nchw.shape
    _, _, H2, W2 = x2_nchw.shape
    assert H1 == 2 * H2 and W1 == 2 * W2, "x1 spatial must be 2x x2 spatial"
    assert w1.shape == (C, C, 1, 1) and w2.shape == (C, C, 1, 1)

    out_dtype = x1_nchw.dtype
    L1 = 2 * W1

    # Free HBM reshape: pair the two full-res rows that share one half-res row.
    x1_r = x1_nchw.reshape(N, C, H2, L1)

    # (Cout, Cin) -> y = W @ X needs no transpose anywhere.
    w1_2d = w1.reshape(C, C)
    w2_2d = w2.reshape(C, C)

    use_mxu = C > 8
    if use_mxu:
        w_specs = [pl.BlockSpec((C, C), lambda n, h: (0, 0)),
                   pl.BlockSpec((C, C), lambda n, h: (0, 0))]
        w1_in, w2_in = w1_2d, w2_2d
    else:
        w_specs = [pl.BlockSpec(memory_space=pltpu.MemorySpace.SMEM),
                   pl.BlockSpec(memory_space=pltpu.MemorySpace.SMEM)]
        w1_in = w1_2d.astype(jnp.float32)
        w2_in = w2_2d.astype(jnp.float32)

    itemsize = jnp.dtype(x1_nchw.dtype).itemsize
    th2 = _pick_row_block(H2, C, W1, W2, itemsize)
    grid = (N, H2 // th2)

    out_r = pl.pallas_call(
        _make_cnn_kernel(C, use_mxu),
        out_shape=jax.ShapeDtypeStruct((N, C, H2, L1), out_dtype),
        grid_spec=pltpu.PrefetchScalarGridSpec(
            num_scalar_prefetch=0,
            grid=grid,
            in_specs=[
                pl.BlockSpec((pl.Squeezed(), C, th2, L1),
                             lambda n, h: (n, 0, h, 0)),
                pl.BlockSpec((pl.Squeezed(), C, th2, W2),
                             lambda n, h: (n, 0, h, 0)),
            ] + w_specs,
            out_specs=pl.BlockSpec((pl.Squeezed(), C, th2, L1),
                                   lambda n, h: (n, 0, h, 0)),
        ),
        compiler_params=pltpu.CompilerParams(
            dimension_semantics=("parallel", "parallel"),
        ),
    )(x1_r, x2_nchw, w1_in, w2_in)

    # Free HBM reshape back to full-resolution NCHW.
    return out_r.reshape(N, C, H1, W1)


def _reference(x1_nchw, x2_nchw, w1, w2):
    """Pure-JAX reference mirroring the PyTorch forward."""
    C = x1_nchw.shape[1]
    w1_2d = w1.reshape(C, C)
    w2_2d = w2.reshape(C, C)
    y1 = jnp.einsum("nchw,dc->ndhw", x1_nchw, w1_2d)
    y2 = jnp.einsum("nchw,dc->ndhw", x2_nchw, w2_2d)
    y2_up = jnp.repeat(jnp.repeat(y2, 2, axis=2), 2, axis=3)  # nearest 2x
    return y2_up + y1


if __name__ == "__main__":
    key = jax.random.PRNGKey(0)
    k1, k2, k3, k4 = jax.random.split(key, 4)

    N, C = 2, 4
    H1, W1 = 16, 16
    H2, W2 = H1 // 2, W1 // 2

    x1 = jax.random.normal(k1, (N, C, H1, W1), dtype=jnp.float32)
    x2 = jax.random.normal(k2, (N, C, H2, W2), dtype=jnp.float32)

    # c2_msra_fill = kaiming normal (fan_out); for a 1x1 conv fan_out = C.
    std = (2.0 / C) ** 0.5
    w1 = std * jax.random.normal(k3, (C, C, 1, 1), dtype=jnp.float32)
    w2 = std * jax.random.normal(k4, (C, C, 1, 1), dtype=jnp.float32)

    cnn = jax.jit(cnn_forward)
    out = jax.block_until_ready(cnn(x1, x2, w1, w2))
    ref = _reference(x1, x2, w1, w2)

    assert out.shape == (N, C, H1, W1)
    assert out.dtype == x1.dtype
    assert jnp.allclose(out, ref, atol=1e-5, rtol=1e-5)

    print("KERNEL_OK")
</pallas_src>

<mosaic_0001>
module attributes {stable_mosaic.version = 11 : i64} {
  func.func @kernel(%arg0: i32, %arg1: i32, %arg2: memref<1x4x8x32xf32, #tpu.memory_space<vmem>>, %arg3: memref<1x4x8x8xf32, #tpu.memory_space<vmem>>, %arg4: memref<4x4xf32, #tpu.memory_space<smem>>, %arg5: memref<4x4xf32, #tpu.memory_space<smem>>, %arg6: memref<1x4x8x32xf32, #tpu.memory_space<vmem>>) attributes {dimension_semantics = [#tpu.dimension_semantics<parallel>, #tpu.dimension_semantics<parallel>], iteration_bounds = array<i64: 2, 1>, scalar_prefetch = 0 : i64, scratch_operands = 0 : i64, tpu.core_type = #tpu.core_type<tc>, window_params = [{transform_indices = @transform_0, window_bounds = array<i64: 1, 4, 8, 32>}, {transform_indices = @transform_1, window_bounds = array<i64: 1, 4, 8, 8>}, {transform_indices = @transform_2, window_bounds = array<i64: 4, 4>}, {transform_indices = @transform_3, window_bounds = array<i64: 4, 4>}, {transform_indices = @transform_4, window_bounds = array<i64: 1, 4, 8, 32>}]} {
    %c0 = arith.constant 0 : index
    %c0_0 = arith.constant 0 : index
    %c0_1 = arith.constant 0 : index
    %c0_2 = arith.constant 0 : index
    %0 = vector.load %arg2[%c0, %c0_0, %c0_1, %c0_2] : memref<1x4x8x32xf32, #tpu.memory_space<vmem>>, vector<1x4x8x32xf32>
    %1 = vector.shape_cast %0 : vector<1x4x8x32xf32> to vector<4x8x32xf32>
    %c0_3 = arith.constant 0 : index
    %c0_4 = arith.constant 0 : index
    %c0_5 = arith.constant 0 : index
    %c0_6 = arith.constant 0 : index
    %2 = vector.load %arg3[%c0_3, %c0_4, %c0_5, %c0_6] : memref<1x4x8x8xf32, #tpu.memory_space<vmem>>, vector<1x4x8x8xf32>
    %3 = vector.shape_cast %2 : vector<1x4x8x8xf32> to vector<4x8x8xf32>
    %c0_7 = arith.constant 0 : index
    %c0_8 = arith.constant 0 : index
    %4 = memref.load %arg4[%c0_7, %c0_8] : memref<4x4xf32, #tpu.memory_space<smem>>
    %5 = vector.extract_strided_slice %1 {offsets = [0, 0, 0], sizes = [1, 8, 32], strides = [1, 1, 1]} : vector<4x8x32xf32> to vector<1x8x32xf32>
    %6 = vector.broadcast %4 : f32 to vector<1x8x32xf32>
    %7 = arith.mulf %6, %5 : vector<1x8x32xf32>
    %c0_9 = arith.constant 0 : index
    %c0_10 = arith.constant 0 : index
    %8 = memref.load %arg5[%c0_9, %c0_10] : memref<4x4xf32, #tpu.memory_space<smem>>
    %9 = vector.extract_strided_slice %3 {offsets = [0, 0, 0], sizes = [1, 8, 8], strides = [1, 1, 1]} : vector<4x8x8xf32> to vector<1x8x8xf32>
    %10 = vector.broadcast %8 : f32 to vector<1x8x8xf32>
    %11 = arith.mulf %10, %9 : vector<1x8x8xf32>
    %c0_11 = arith.constant 0 : index
    %c1 = arith.constant 1 : index
    %12 = memref.load %arg4[%c0_11, %c1] : memref<4x4xf32, #tpu.memory_space<smem>>
    %13 = vector.extract_strided_slice %1 {offsets = [1, 0, 0], sizes = [1, 8, 32], strides = [1, 1, 1]} : vector<4x8x32xf32> to vector<1x8x32xf32>
    %14 = vector.broadcast %12 : f32 to vector<1x8x32xf32>
    %15 = arith.mulf %14, %13 : vector<1x8x32xf32>
    %16 = arith.addf %7, %15 : vector<1x8x32xf32>
    %c0_12 = arith.constant 0 : index
    %c1_13 = arith.constant 1 : index
    %17 = memref.load %arg5[%c0_12, %c1_13] : memref<4x4xf32, #tpu.memory_space<smem>>
    %18 = vector.extract_strided_slice %3 {offsets = [1, 0, 0], sizes = [1, 8, 8], strides = [1, 1, 1]} : vector<4x8x8xf32> to vector<1x8x8xf32>
    %19 = vector.broadcast %17 : f32 to vector<1x8x8xf32>
    %20 = arith.mulf %19, %18 : vector<1x8x8xf32>
    %21 = arith.addf %11, %20 : vector<1x8x8xf32>
    %c0_14 = arith.constant 0 : index
    %c2 = arith.constant 2 : index
    %22 = memref.load %arg4[%c0_14, %c2] : memref<4x4xf32, #tpu.memory_space<smem>>
    %23 = vector.extract_strided_slice %1 {offsets = [2, 0, 0], sizes = [1, 8, 32], strides = [1, 1, 1]} : vector<4x8x32xf32> to vector<1x8x32xf32>
    %24 = vector.broadcast %22 : f32 to vector<1x8x32xf32>
    %25 = arith.mulf %24, %23 : vector<1x8x32xf32>
    %26 = arith.addf %16, %25 : vector<1x8x32xf32>
    %c0_15 = arith.constant 0 : index
    %c2_16 = arith.constant 2 : index
    %27 = memref.load %arg5[%c0_15, %c2_16] : memref<4x4xf32, #tpu.memory_space<smem>>
    %28 = vector.extract_strided_slice %3 {offsets = [2, 0, 0], sizes = [1, 8, 8], strides = [1, 1, 1]} : vector<4x8x8xf32> to vector<1x8x8xf32>
    %29 = vector.broadcast %27 : f32 to vector<1x8x8xf32>
    %30 = arith.mulf %29, %28 : vector<1x8x8xf32>
    %31 = arith.addf %21, %30 : vector<1x8x8xf32>
    %c0_17 = arith.constant 0 : index
    %c3 = arith.constant 3 : index
    %32 = memref.load %arg4[%c0_17, %c3] : memref<4x4xf32, #tpu.memory_space<smem>>
    %33 = vector.extract_strided_slice %1 {offsets = [3, 0, 0], sizes = [1, 8, 32], strides = [1, 1, 1]} : vector<4x8x32xf32> to vector<1x8x32xf32>
    %34 = vector.broadcast %32 : f32 to vector<1x8x32xf32>
    %35 = arith.mulf %34, %33 : vector<1x8x32xf32>
    %36 = arith.addf %26, %35 : vector<1x8x32xf32>
    %c0_18 = arith.constant 0 : index
    %c3_19 = arith.constant 3 : index
    %37 = memref.load %arg5[%c0_18, %c3_19] : memref<4x4xf32, #tpu.memory_space<smem>>
    %38 = vector.extract_strided_slice %3 {offsets = [3, 0, 0], sizes = [1, 8, 8], strides = [1, 1, 1]} : vector<4x8x8xf32> to vector<1x8x8xf32>
    %39 = vector.broadcast %37 : f32 to vector<1x8x8xf32>
    %40 = arith.mulf %39, %38 : vector<1x8x8xf32>
    %41 = arith.addf %31, %40 : vector<1x8x8xf32>
    %c1_20 = arith.constant 1 : index
    %c0_21 = arith.constant 0 : index
    %42 = memref.load %arg4[%c1_20, %c0_21] : memref<4x4xf32, #tpu.memory_space<smem>>
    %43 = vector.extract_strided_slice %1 {offsets = [0, 0, 0], sizes = [1, 8, 32], strides = [1, 1, 1]} : vector<4x8x32xf32> to vector<1x8x32xf32>
    %44 = vector.broadcast %42 : f32 to vector<1x8x32xf32>
    %45 = arith.mulf %44, %43 : vector<1x8x32xf32>
    %c1_22 = arith.constant 1 : index
    %c0_23 = arith.constant 0 : index
    %46 = memref.load %arg5[%c1_22, %c0_23] : memref<4x4xf32, #tpu.memory_space<smem>>
    %47 = vector.extract_strided_slice %3 {offsets = [0, 0, 0], sizes = [1, 8, 8], strides = [1, 1, 1]} : vector<4x8x8xf32> to vector<1x8x8xf32>
    %48 = vector.broadcast %46 : f32 to vector<1x8x8xf32>
    %49 = arith.mulf %48, %47 : vector<1x8x8xf32>
    %c1_24 = arith.constant 1 : index
    %c1_25 = arith.constant 1 : index
    %50 = memref.load %arg4[%c1_24, %c1_25] : memref<4x4xf32, #tpu.memory_space<smem>>
    %51 = vector.extract_strided_slice %1 {offsets = [1, 0, 0], sizes = [1, 8, 32], strides = [1, 1, 1]} : vector<4x8x32xf32> to vector<1x8x32xf32>
    %52 = vector.broadcast %50 : f32 to vector<1x8x32xf32>
    %53 = arith.mulf %52, %51 : vector<1x8x32xf32>
    %54 = arith.addf %45, %53 : vector<1x8x32xf32>
    %c1_26 = arith.constant 1 : index
    %c1_27 = arith.constant 1 : index
    %55 = memref.load %arg5[%c1_26, %c1_27] : memref<4x4xf32, #tpu.memory_space<smem>>
    %56 = vector.extract_strided_slice %3 {offsets = [1, 0, 0], sizes = [1, 8, 8], strides = [1, 1, 1]} : vector<4x8x8xf32> to vector<1x8x8xf32>
    %57 = vector.broadcast %55 : f32 to vector<1x8x8xf32>
    %58 = arith.mulf %57, %56 : vector<1x8x8xf32>
    %59 = arith.addf %49, %58 : vector<1x8x8xf32>
    %c1_28 = arith.constant 1 : index
    %c2_29 = arith.constant 2 : index
    %60 = memref.load %arg4[%c1_28, %c2_29] : memref<4x4xf32, #tpu.memory_space<smem>>
    %61 = vector.extract_strided_slice %1 {offsets = [2, 0, 0], sizes = [1, 8, 32], strides = [1, 1, 1]} : vector<4x8x32xf32> to vector<1x8x32xf32>
    %62 = vector.broadcast %60 : f32 to vector<1x8x32xf32>
    %63 = arith.mulf %62, %61 : vector<1x8x32xf32>
    %64 = arith.addf %54, %63 : vector<1x8x32xf32>
    %c1_30 = arith.constant 1 : index
    %c2_31 = arith.constant 2 : index
    %65 = memref.load %arg5[%c1_30, %c2_31] : memref<4x4xf32, #tpu.memory_space<smem>>
    %66 = vector.extract_strided_slice %3 {offsets = [2, 0, 0], sizes = [1, 8, 8], strides = [1, 1, 1]} : vector<4x8x8xf32> to vector<1x8x8xf32>
    %67 = vector.broadcast %65 : f32 to vector<1x8x8xf32>
    %68 = arith.mulf %67, %66 : vector<1x8x8xf32>
    %69 = arith.addf %59, %68 : vector<1x8x8xf32>
    %c1_32 = arith.constant 1 : index
    %c3_33 = arith.constant 3 : index
    %70 = memref.load %arg4[%c1_32, %c3_33] : memref<4x4xf32, #tpu.memory_space<smem>>
    %71 = vector.extract_strided_slice %1 {offsets = [3, 0, 0], sizes = [1, 8, 32], strides = [1, 1, 1]} : vector<4x8x32xf32> to vector<1x8x32xf32>
    %72 = vector.broadcast %70 : f32 to vector<1x8x32xf32>
    %73 = arith.mulf %72, %71 : vector<1x8x32xf32>
    %74 = arith.addf %64, %73 : vector<1x8x32xf32>
    %c1_34 = arith.constant 1 : index
    %c3_35 = arith.constant 3 : index
    %75 = memref.load %arg5[%c1_34, %c3_35] : memref<4x4xf32, #tpu.memory_space<smem>>
    %76 = vector.extract_strided_slice %3 {offsets = [3, 0, 0], sizes = [1, 8, 8], strides = [1, 1, 1]} : vector<4x8x8xf32> to vector<1x8x8xf32>
    %77 = vector.broadcast %75 : f32 to vector<1x8x8xf32>
    %78 = arith.mulf %77, %76 : vector<1x8x8xf32>
    %79 = arith.addf %69, %78 : vector<1x8x8xf32>
    %c2_36 = arith.constant 2 : index
    %c0_37 = arith.constant 0 : index
    %80 = memref.load %arg4[%c2_36, %c0_37] : memref<4x4xf32, #tpu.memory_space<smem>>
    %81 = vector.extract_strided_slice %1 {offsets = [0, 0, 0], sizes = [1, 8, 32], strides = [1, 1, 1]} : vector<4x8x32xf32> to vector<1x8x32xf32>
    %82 = vector.broadcast %80 : f32 to vector<1x8x32xf32>
    %83 = arith.mulf %82, %81 : vector<1x8x32xf32>
    %c2_38 = arith.constant 2 : index
    %c0_39 = arith.constant 0 : index
    %84 = memref.load %arg5[%c2_38, %c0_39] : memref<4x4xf32, #tpu.memory_space<smem>>
    %85 = vector.extract_strided_slice %3 {offsets = [0, 0, 0], sizes = [1, 8, 8], strides = [1, 1, 1]} : vector<4x8x8xf32> to vector<1x8x8xf32>
    %86 = vector.broadcast %84 : f32 to vector<1x8x8xf32>
    %87 = arith.mulf %86, %85 : vector<1x8x8xf32>
    %c2_40 = arith.constant 2 : index
    %c1_41 = arith.constant 1 : index
    %88 = memref.load %arg4[%c2_40, %c1_41] : memref<4x4xf32, #tpu.memory_space<smem>>
    %89 = vector.extract_strided_slice %1 {offsets = [1, 0, 0], sizes = [1, 8, 32], strides = [1, 1, 1]} : vector<4x8x32xf32> to vector<1x8x32xf32>
    %90 = vector.broadcast %88 : f32 to vector<1x8x32xf32>
    %91 = arith.mulf %90, %89 : vector<1x8x32xf32>
    %92 = arith.addf %83, %91 : vector<1x8x32xf32>
    %c2_42 = arith.constant 2 : index
    %c1_43 = arith.constant 1 : index
    %93 = memref.load %arg5[%c2_42, %c1_43] : memref<4x4xf32, #tpu.memory_space<smem>>
    %94 = vector.extract_strided_slice %3 {offsets = [1, 0, 0], sizes = [1, 8, 8], strides = [1, 1, 1]} : vector<4x8x8xf32> to vector<1x8x8xf32>
    %95 = vector.broadcast %93 : f32 to vector<1x8x8xf32>
    %96 = arith.mulf %95, %94 : vector<1x8x8xf32>
    %97 = arith.addf %87, %96 : vector<1x8x8xf32>
    %c2_44 = arith.constant 2 : index
    %c2_45 = arith.constant 2 : index
    %98 = memref.load %arg4[%c2_44, %c2_45] : memref<4x4xf32, #tpu.memory_space<smem>>
    %99 = vector.extract_strided_slice %1 {offsets = [2, 0, 0], sizes = [1, 8, 32], strides = [1, 1, 1]} : vector<4x8x32xf32> to vector<1x8x32xf32>
    %100 = vector.broadcast %98 : f32 to vector<1x8x32xf32>
    %101 = arith.mulf %100, %99 : vector<1x8x32xf32>
    %102 = arith.addf %92, %101 : vector<1x8x32xf32>
    %c2_46 = arith.constant 2 : index
    %c2_47 = arith.constant 2 : index
    %103 = memref.load %arg5[%c2_46, %c2_47] : memref<4x4xf32, #tpu.memory_space<smem>>
    %104 = vector.extract_strided_slice %3 {offsets = [2, 0, 0], sizes = [1, 8, 8], strides = [1, 1, 1]} : vector<4x8x8xf32> to vector<1x8x8xf32>
    %105 = vector.broadcast %103 : f32 to vector<1x8x8xf32>
    %106 = arith.mulf %105, %104 : vector<1x8x8xf32>
    %107 = arith.addf %97, %106 : vector<1x8x8xf32>
    %c2_48 = arith.constant 2 : index
    %c3_49 = arith.constant 3 : index
    %108 = memref.load %arg4[%c2_48, %c3_49] : memref<4x4xf32, #tpu.memory_space<smem>>
    %109 = vector.extract_strided_slice %1 {offsets = [3, 0, 0], sizes = [1, 8, 32], strides = [1, 1, 1]} : vector<4x8x32xf32> to vector<1x8x32xf32>
    %110 = vector.broadcast %108 : f32 to vector<1x8x32xf32>
    %111 = arith.mulf %110, %109 : vector<1x8x32xf32>
    %112 = arith.addf %102, %111 : vector<1x8x32xf32>
    %c2_50 = arith.constant 2 : index
    %c3_51 = arith.constant 3 : index
    %113 = memref.load %arg5[%c2_50, %c3_51] : memref<4x4xf32, #tpu.memory_space<smem>>
    %114 = vector.extract_strided_slice %3 {offsets = [3, 0, 0], sizes = [1, 8, 8], strides = [1, 1, 1]} : vector<4x8x8xf32> to vector<1x8x8xf32>
    %115 = vector.broadcast %113 : f32 to vector<1x8x8xf32>
    %116 = arith.mulf %115, %114 : vector<1x8x8xf32>
    %117 = arith.addf %107, %116 : vector<1x8x8xf32>
    %c3_52 = arith.constant 3 : index
    %c0_53 = arith.constant 0 : index
    %118 = memref.load %arg4[%c3_52, %c0_53] : memref<4x4xf32, #tpu.memory_space<smem>>
    %119 = vector.extract_strided_slice %1 {offsets = [0, 0, 0], sizes = [1, 8, 32], strides = [1, 1, 1]} : vector<4x8x32xf32> to vector<1x8x32xf32>
    %120 = vector.broadcast %118 : f32 to vector<1x8x32xf32>
    %121 = arith.mulf %120, %119 : vector<1x8x32xf32>
    %c3_54 = arith.constant 3 : index
    %c0_55 = arith.constant 0 : index
    %122 = memref.load %arg5[%c3_54, %c0_55] : memref<4x4xf32, #tpu.memory_space<smem>>
    %123 = vector.extract_strided_slice %3 {offsets = [0, 0, 0], sizes = [1, 8, 8], strides = [1, 1, 1]} : vector<4x8x8xf32> to vector<1x8x8xf32>
    %124 = vector.broadcast %122 : f32 to vector<1x8x8xf32>
    %125 = arith.mulf %124, %123 : vector<1x8x8xf32>
    %c3_56 = arith.constant 3 : index
    %c1_57 = arith.constant 1 : index
    %126 = memref.load %arg4[%c3_56, %c1_57] : memref<4x4xf32, #tpu.memory_space<smem>>
    %127 = vector.extract_strided_slice %1 {offsets = [1, 0, 0], sizes = [1, 8, 32], strides = [1, 1, 1]} : vector<4x8x32xf32> to vector<1x8x32xf32>
    %128 = vector.broadcast %126 : f32 to vector<1x8x32xf32>
    %129 = arith.mulf %128, %127 : vector<1x8x32xf32>
    %130 = arith.addf %121, %129 : vector<1x8x32xf32>
    %c3_58 = arith.constant 3 : index
    %c1_59 = arith.constant 1 : index
    %131 = memref.load %arg5[%c3_58, %c1_59] : memref<4x4xf32, #tpu.memory_space<smem>>
    %132 = vector.extract_strided_slice %3 {offsets = [1, 0, 0], sizes = [1, 8, 8], strides = [1, 1, 1]} : vector<4x8x8xf32> to vector<1x8x8xf32>
    %133 = vector.broadcast %131 : f32 to vector<1x8x8xf32>
    %134 = arith.mulf %133, %132 : vector<1x8x8xf32>
    %135 = arith.addf %125, %134 : vector<1x8x8xf32>
    %c3_60 = arith.constant 3 : index
    %c2_61 = arith.constant 2 : index
    %136 = memref.load %arg4[%c3_60, %c2_61] : memref<4x4xf32, #tpu.memory_space<smem>>
    %137 = vector.extract_strided_slice %1 {offsets = [2, 0, 0], sizes = [1, 8, 32], strides = [1, 1, 1]} : vector<4x8x32xf32> to vector<1x8x32xf32>
    %138 = vector.broadcast %136 : f32 to vector<1x8x32xf32>
    %139 = arith.mulf %138, %137 : vector<1x8x32xf32>
    %140 = arith.addf %130, %139 : vector<1x8x32xf32>
    %c3_62 = arith.constant 3 : index
    %c2_63 = arith.constant 2 : index
    %141 = memref.load %arg5[%c3_62, %c2_63] : memref<4x4xf32, #tpu.memory_space<smem>>
    %142 = vector.extract_strided_slice %3 {offsets = [2, 0, 0], sizes = [1, 8, 8], strides = [1, 1, 1]} : vector<4x8x8xf32> to vector<1x8x8xf32>
    %143 = vector.broadcast %141 : f32 to vector<1x8x8xf32>
    %144 = arith.mulf %143, %142 : vector<1x8x8xf32>
    %145 = arith.addf %135, %144 : vector<1x8x8xf32>
    %c3_64 = arith.constant 3 : index
    %c3_65 = arith.constant 3 : index
    %146 = memref.load %arg4[%c3_64, %c3_65] : memref<4x4xf32, #tpu.memory_space<smem>>
    %147 = vector.extract_strided_slice %1 {offsets = [3, 0, 0], sizes = [1, 8, 32], strides = [1, 1, 1]} : vector<4x8x32xf32> to vector<1x8x32xf32>
    %148 = vector.broadcast %146 : f32 to vector<1x8x32xf32>
    %149 = arith.mulf %148, %147 : vector<1x8x32xf32>
    %150 = arith.addf %140, %149 : vector<1x8x32xf32>
    %c3_66 = arith.constant 3 : index
    %c3_67 = arith.constant 3 : index
    %151 = memref.load %arg5[%c3_66, %c3_67] : memref<4x4xf32, #tpu.memory_space<smem>>
    %152 = vector.extract_strided_slice %3 {offsets = [3, 0, 0], sizes = [1, 8, 8], strides = [1, 1, 1]} : vector<4x8x8xf32> to vector<1x8x8xf32>
    %153 = vector.broadcast %151 : f32 to vector<1x8x8xf32>
    %154 = arith.mulf %153, %152 : vector<1x8x8xf32>
    %155 = arith.addf %145, %154 : vector<1x8x8xf32>
    %156 = tpu.concatenate %36, %74, %112, %150 in 0 : vector<1x8x32xf32>, vector<1x8x32xf32>, vector<1x8x32xf32>, vector<1x8x32xf32> -> vector<4x8x32xf32>
    %157 = tpu.concatenate %41, %79, %117, %155 in 0 : vector<1x8x8xf32>, vector<1x8x8xf32>, vector<1x8x8xf32>, vector<1x8x8xf32> -> vector<4x8x8xf32>
    %158 = vector.shape_cast %157 : vector<4x8x8xf32> to vector<4x8x8x1xf32>
    %159 = vector.shape_cast %158 : vector<4x8x8x1xf32> to vector<4x8x8x1xf32>
    %160 = vector.broadcast %159 : vector<4x8x8x1xf32> to vector<4x8x8x2xf32>
    %161 = vector.shape_cast %160 : vector<4x8x8x2xf32> to vector<4x8x16xf32>
    %162 = tpu.concatenate %161, %161 in 2 : vector<4x8x16xf32>, vector<4x8x16xf32> -> vector<4x8x32xf32>
    %163 = arith.addf %156, %162 : vector<4x8x32xf32>
    %c0_68 = arith.constant 0 : index
    %c0_69 = arith.constant 0 : index
    %c0_70 = arith.constant 0 : index
    %c0_71 = arith.constant 0 : index
    %164 = vector.load %arg6[%c0_68, %c0_69, %c0_70, %c0_71] : memref<1x4x8x32xf32, #tpu.memory_space<vmem>>, vector<1x4x8x32xf32>
    %165 = vector.shape_cast %164 : vector<1x4x8x32xf32> to vector<4x8x32xf32>
    %166 = vector.shape_cast %163 : vector<4x8x32xf32> to vector<1x4x8x32xf32>
    tpu.vector_store %arg6[%c0_68, %c0_69, %c0_70, %c0_71], %166 {strides = array<i32>} : memref<1x4x8x32xf32, #tpu.memory_space<vmem>>, vector<1x4x8x32xf32>,
    return
  }
  func.func @transform_0(%arg0: i32, %arg1: i32) -> (i32, i32, i32, i32) {
    %c0_i32 = arith.constant 0 : i32
    %c0_i32_0 = arith.constant 0 : i32
    %c0_i32_1 = arith.constant 0 : i32
    return %arg0, %c0_i32, %arg1, %c0_i32_0 : i32, i32, i32, i32
  }
  func.func @transform_1(%arg0: i32, %arg1: i32) -> (i32, i32, i32, i32) {
    %c0_i32 = arith.constant 0 : i32
    %c0_i32_0 = arith.constant 0 : i32
    %c0_i32_1 = arith.constant 0 : i32
    return %arg0, %c0_i32, %arg1, %c0_i32_0 : i32, i32, i32, i32
  }
  func.func @transform_2(%arg0: i32, %arg1: i32) -> (i32, i32) {
    %c0_i32 = arith.constant 0 : i32
    %c0_i32_0 = arith.constant 0 : i32
    %c0_i32_1 = arith.constant 0 : i32
    return %c0_i32, %c0_i32_0 : i32, i32
  }
  func.func @transform_3(%arg0: i32, %arg1: i32) -> (i32, i32) {
    %c0_i32 = arith.constant 0 : i32
    %c0_i32_0 = arith.constant 0 : i32
    %c0_i32_1 = arith.constant 0 : i32
    return %c0_i32, %c0_i32_0 : i32, i32
  }
  func.func @transform_4(%arg0: i32, %arg1: i32) -> (i32, i32, i32, i32) {
    %c0_i32 = arith.constant 0 : i32
    %c0_i32_0 = arith.constant 0 : i32
    %c0_i32_1 = arith.constant 0 : i32
    return %arg0, %c0_i32, %arg1, %c0_i32_0 : i32, i32, i32, i32
  }
}

</mosaic_0001>

<bundles_post_ra>
// kernel: cnn_forward.1
= control target key start
LH: loop header
LB: loop body
LE: loop exit
PB: predicated region body
PF: predicated region fallthrough
CT: control target
= control target key end

     0   :  { %9 = vsyncpa [#allocation3], 0  ;;  %s2167_s0 = inlined_call_operand.vmem [shape: f32[2,4,8,32], index: 0, kind: input, shape index: {}]   ;;  %s2168_s1 = inlined_call_operand.vmem [shape: f32[2,4,8,8], index: 1, kind: input, shape index: {}]   ;;  %s2169_s2 = inlined_call_operand.vmem [shape: f32[4,4], index: 2, kind: input, shape index: {}]   ;;  %s2170_s3 = inlined_call_operand.vmem [shape: f32[4,4], index: 3, kind: input, shape index: {}]   ;;  %s2171_s4 = inlined_call_operand.vmem [shape: f32[2,4,8,32], index: 4, kind: output, shape index: {}]  }
   0x1   :  { %10 = vsyncpa [#allocation5], 0  ;;  %s1688_s15 = smov 0   ;;  %s1690_s16 = smov 0  }
   0x2   :  { %s1692_s17 = smov 0  }
   0x3 LB: > { %s1484_s18 = sadd.s32 4294967295, %s1649_s17   ;;  %s28_s19 = sadd.s32 1, %s1645_s16  ;;  %s1649_s17 = sphi %s1692_s17, %s16_s17   ;;  %s1645_s16 = sphi %s1690_s16, %s2181_s16   ;;  %s1641_s15 = sphi %s1688_s15, %s2180_s15  }
   0x4   : > { %p30_p0 = scmp.ge.s32.totalorder %s28_s19, 2  ;;  %p1486_p1 = scmp.ge.s32.totalorder %s1649_s17, 1 }
   0x5   : > { %p159_p2 = scmp.lt.s32.totalorder %s1649_s17, 3  ;;  %p1713_p4 = scmp.eq.s32.totalorder %s1484_s18, 0 }
   0x6   : > { %s2183_s19 = smov (%p30_p0, %s28_s19), 0  ;;  %s172_s24 = sshll.u32 %s2169_s2, 4  ;;  %s173_s24 = int_to_ptr.vmem [resolvable:$true] %s172_s24 }
   0x7   : > { %p1709_p3 = pnand %p1486_p1, %p159_p2  ;;  %s183_s27 = sshll.u32 %s2170_s3, 4  ;;  %s184_s27 = int_to_ptr.vmem [resolvable:$true] %s183_s27 }
   0x8   : > { %s2176_s21 = scalar_select %p1713_p4, 1, 0 }
   0x9   : > { %s2175_s20 = scalar_select %p1709_p3, 1, 0 }
   0xa   : > { %p1542_p5 = pneg %p1709_p3  ;;  %s1589_s29 = scalar_lea.vmem %s173_s24, 64 }
   0xb   : > { %p1590_p7 = scmp.ne.s32.totalorder %s173_s24, %s1589_s29  ;;  %p1597_p11 = scmp.lt.s32.totalorder %s173_s24, %s173_s24 }
   0xc   : > { %p1727_p6 = pnand %p1713_p4, %p1542_p5  ;;  %p1598_p12 = scmp.lt.s32.totalorder %s1589_s29, %s1589_s29 }
   0xe   : > { %p1591_p8 = pneg %p1727_p6  ;;  %p1599_p13 = por %p1598_p12, %p1597_p11 }
  0x10   : > { %p1592_p9 = pnand %p1591_p8, %p1590_p7 }
  0x12   : > { %p1593_p10 = pneg %p1592_p9 }
  0x14   : > { %p1600_p0 = pnand %p1599_p13, %p1593_p10 }
  0x16   : > { %1603 = shalt.err (!%p1600_p0)
}
  0x17   : > { %s1651_s30 = smov [#allocation2]   ;;  %s1604_s5 = scalar_lea.vmem %s184_s27, 64 }
  0x18   : > { %1545 = dma.vmem_to_smem (!%p1727_p6), %s173_s24, 64, %s1651_s30, [#allocation3]  }
  0x19   : > { %p1605_p1 = scmp.ne.s32.totalorder %s184_s27, %s1604_s5  ;;  %p1612_p4 = scmp.lt.s32.totalorder %s184_s27, %s184_s27 }
  0x1a   : > { %p1613_p3 = scmp.lt.s32.totalorder %s1604_s5, %s1604_s5 }
  0x1b   : > { %p1607_p2 = pnand %p1605_p1, %p1591_p8 }
  0x1c   : > { %p1614_p7 = por %p1613_p3, %p1612_p4 }
  0x1d   : > { %p1608_p5 = pneg %p1607_p2 }
  0x1f   : > { %p1615_p9 = pnand %p1614_p7, %p1608_p5 }
  0x21   : > { %1618 = shalt.err (!%p1615_p9)
}
  0x22   : > { %s1652_s6 = smov [#allocation4]   ;;  %p2178_p10 = scmp.ne.s32.totalorder %s2175_s20, 0 }
  0x23   : > { %1548 = dma.vmem_to_smem (!%p1727_p6), %s184_s27, 64, %s1652_s6, [#allocation5]  }
  0x24   : > { %218 = sbr.rel (%p2178_p10) target bundleno = 532 (0x214), region = 36  ;;  %p2179_p11 = scmp.ne.s32.totalorder (!%p2178_p10), %s2176_s21, 0 }
  0x29   : > { %1632 = dma.done.wait (%p2179_p11), [#allocation3], 64  }
  0x2a   : > { %1634 = vsyncadd (%p2179_p11), [#allocation3], 4294967232 }
  0x2b   : > { %1636 = dma.done.wait (%p2179_p11), [#allocation5], 64  }
  0x2c   : > { %1638 = vsyncadd (%p2179_p11), [#allocation5], 4294967232 }
  0x2d   : > { %228 = sfence }
  0x2e   : > { %p263_p3 = scmp.lt.s32.totalorder %s1641_s15, 1  ;;  %s298_s7 = sld [smem:[#allocation4]]  ;;  %v415_v0 = vlaneseq  ;;  %vm1295_vm0 = vcmask 15360   ;;  %vm1300_vm1 = vcmask 31744   ;;  %vm1305_vm2 = vcmask 48128  }
  0x2f   : > { %s1500_s8 = sld [smem:[#allocation4 + $0x1]]  ;;  %s1655_s30 = smov 2   ;;  %vm1310_vm3 = vcmask 64512   ;;  %vm1315_vm4 = vcmask 80896   ;;  %vm1320_vm5 = vcmask 97280   ;;  %vm1325_vm6 = vcmask 113664  }
  0x30   : > { %s2185_s15 = smov (!%p263_p3, %s1641_s15), 1  ;;  %s1502_s9 = sld [smem:[#allocation4 + $0x2]]  ;;  %v1765_v9 = vshrl.u32 %v415_v0, 7  ;;  %vm1346_vm7 = vcmask 130048   ;;  %vm1355_vm8 = vcmask 261120  }
  0x31   : > { %s1749_s10 = sshll.u32 %s2185_s15, 5  ;;  %s1504_s11 = sld [smem:[#allocation4 + $0x3]] }
  0x32   : > { %s278_s14 = scalar_lea.vmem %s2168_s1, %s1749_s10  ;;  %s1506_s18 = sld [smem:[#allocation4 + $0x80]]  ;;  %v1772_v17 = vsub.s32 2, %v1765_v9  ;;  %v1775_v18 = vsub.s32 0, %v1765_v9  ;;  %v1778_v19 = vsub.s32 3, %v1765_v9  ;;  %v1781_v20 = vsub.s32 1, %v1765_v9 }
  0x33   : > { %v1755_v1 = vld [vmem:[%s278_s14] sm:$0xff]  ;;  %v1757_v2 = vld [vmem:[%s278_s14 + $0x8] sm:$0xff]  ;;  %v1759_v4 = vld [vmem:[%s278_s14 + $0x10] sm:$0xff]  ;;  %s1508_s15 = sld [smem:[#allocation4 + $0x81]]  ;;  %v1788_v28 = vsub.s32 5, %v1765_v9  ;;  %v1794_v32 = vsub.s32 4, %v1765_v9 }
  0x34   : > { %v299_v3 = vstv %s298_s7  ;;  %v1762_v7 = vld [vmem:[%s278_s14 + $0x18] sm:$0xff]  ;;  %s1510_s20 = sld [smem:[#allocation4 + $0x82]]  ;;  %v1799_v36 = vsub.s32 7, %v1765_v9  ;;  %v1803_v38 = vsub.s32 6, %v1765_v9  ;;  %s1656_s5 = smov 4  }
  0x35   : > { %v300_v5 = vmul.f32 %v299_v3, %v1755_v1  ;;  %v306_v6 = vstv %s1500_s8  ;;  %s1769_s21 = sld [smem:[#allocation4 + $0x83]]  ;;  %s1657_s6 = smov 6  }
  0x36   : > { %v307_v8 = vmul.f32 %v306_v6, %v1757_v2  ;;  %v314_v10 = vstv %s1502_s9  ;;  %s1514_s22 = sld [smem:[#allocation4 + $0x100]]  ;;  %s1658_s7 = smov 8  }
  0x37   : > { %v315_v12 = vmul.f32 %v314_v10, %v1759_v4  ;;  %v322_v13 = vstv %s1504_s11  ;;  %s1516_s23 = sld [smem:[#allocation4 + $0x101]]  ;;  %s1659_s8 = smov 10  }
  0x38   : > { %v308_v11 = vadd.f32 %v307_v8, %v300_v5  ;;  %v323_v14 = vmul.f32 %v322_v13, %v1762_v7  ;;  %v329_v15 = vstv %s1506_s18  ;;  %s1518_s24 = sld [smem:[#allocation4 + $0x102]]  ;;  %s1660_s9 = smov 12  }
  0x39   : > { %v336_v21 = vstv %s1508_s15  ;;  %v330_v23 = vmul.f32 %v329_v15, %v1755_v1  ;;  %s1520_s25 = sld [smem:[#allocation4 + $0x103]]  ;;  %s1661_s11 = smov 14  }
  0x3a   : > { %v316_v16 = vadd.f32 %v315_v12, %v308_v11  ;;  %v337_v24 = vmul.f32 %v336_v21, %v1757_v2  ;;  %v344_v25 = vstv %s1510_s20  ;;  %s1522_s26 = sld [smem:[#allocation4 + $0x180]]  ;;  %s1662_s12 = smov 16  }
  0x3b   : > { %v345_v29 = vmul.f32 %v344_v25, %v1759_v4  ;;  %v352_v34 = vstv %s1769_s21  ;;  %s1524_s27 = sld [smem:[#allocation4 + $0x181]] }
  0x3c   : > { %v324_v22 = vadd.f32 %v323_v14, %v316_v16  ;;  %v338_v33 = vadd.f32 %v337_v24, %v330_v23  ;;  %v353_v40 = vmul.f32 %v352_v34, %v1762_v7  ;;  %v359_v44 = vstv %s1514_s22  ;;  %s1526_s28 = sld [smem:[#allocation4 + $0x182]]  ;;  %s270_s22 = scalar_lea.vmem %s2167_s0, %s1749_s10 }
  0x3d   : > { %v366_v45 = vstv %s1516_s23  ;;  %v360_v46 = vmul.f32 %v359_v44, %v1755_v1  ;;  %s1528_s29 = sld [smem:[#allocation4 + $0x183]] }
  0x3e   : > { %v432_v26 = vrot.slane %v324_v22, %v1772_v17  ;;  %v418_v27 = vrot.slane %v324_v22, %v1775_v18  ;;  %v439_v30 = vrot.slane %v324_v22, %v1778_v19  ;;  %v425_v31 = vrot.slane %v324_v22, %v1781_v20  ;;  %s295_s13 = sld [smem:[#allocation2]] }
  0x3f   : > { %v453_v35 = vrot.slane %v324_v22, %v1788_v28  ;;  %v446_v37 = vrot.slane %v324_v22, %v1794_v32  ;;  %v346_v39 = vadd.f32 %v345_v29, %v338_v33  ;;  %v467_v41 = vrot.slane %v324_v22, %v1799_v36  ;;  %s1499_s14 = sld [smem:[#allocation2 + $0x1]] }
  0x40   : > { %434 = vbcast.lane.b32.xlu1 %v432_v26, 256  ;;  %420 = vbcast.lane.b32.xlu0 %v418_v27, 256  ;;  %v460_v42 = vrot.slane %v324_v22, %v1803_v38  ;;  %v367_v49 = vmul.f32 %v366_v45, %v1757_v2  ;;  %v374_v50 = vstv %s1518_s24  ;;  %v382_v55 = vstv %s1520_s25  ;;  %s1501_s18 = sld [smem:[#allocation2 + $0x2]] }
  0x41   : > { %v354_v43 = vadd.f32 %v353_v40, %v346_v39  ;;  %v375_v51 = vmul.f32 %v374_v50, %v1759_v4  ;;  %v383_v56 = vmul.f32 %v382_v55, %v1762_v7  ;;  %v389_v63 = vstv %s1522_s26  ;;  %s1513_s15 = sld [smem:[#allocation2 + $0x100]] }
  0x42   : > { %v368_v54 = vadd.f32 %v367_v49, %v360_v46  ;;  %v396_v0 = vstv %s1524_s27  ;;  %v390_v3 = vmul.f32 %v389_v63, %v1755_v1  ;;  %v404_v10 = vstv %s1526_s28  ;;  %s1515_s23 = sld [smem:[#allocation2 + $0x101]] }
  0x43   : > { %v481_v47 = vrot.slane %v354_v43, %v1781_v20  ;;  %v474_v48 = vrot.slane %v354_v43, %v1775_v18  ;;  %v495_v52 = vrot.slane %v354_v43, %v1778_v19  ;;  %v488_v53 = vrot.slane %v354_v43, %v1772_v17  ;;  %s1503_s24 = sld [smem:[#allocation2 + $0x3]] }
  0x44   : > { %441 = vbcast.lane.b32.xlu1 %v439_v30, 256  ;;  %427 = vbcast.lane.b32.xlu0 %v425_v31, 256  ;;  %v509_v57 = vrot.slane %v354_v43, %v1788_v28  ;;  %v502_v58 = vrot.slane %v354_v43, %v1794_v32  ;;  %v376_v59 = vadd.f32 %v375_v51, %v368_v54  ;;  %v412_v15 = vstv %s1528_s29  ;;  %s1517_s25 = sld [smem:[#allocation2 + $0x102]] }
  0x45   : > { %v523_v60 = vrot.slane %v354_v43, %v1799_v36  ;;  %v516_v61 = vrot.slane %v354_v43, %v1803_v38  ;;  %v397_v8 = vmul.f32 %v396_v0, %v1757_v2  ;;  %v405_v11 = vmul.f32 %v404_v10, %v1759_v4  ;;  %s1519_s26 = sld [smem:[#allocation2 + $0x103]] }
  0x46   : > { %v384_v62 = vadd.f32 %v383_v56, %v376_v59  ;;  %v413_v1 = vmul.f32 %v412_v15, %v1762_v7  ;;  %s1505_s27 = sld [smem:[#allocation2 + $0x80]] }
  0x47   : > { %v398_v14 = vadd.f32 %v397_v8, %v390_v3  ;;  %s1507_s28 = sld [smem:[#allocation2 + $0x81]] }
  0x48   : > { %455 = vbcast.lane.b32.xlu1 %v453_v35, 256  ;;  %448 = vbcast.lane.b32.xlu0 %v446_v37, 256  ;;  %v537_v5 = vrot.slane %v384_v62, %v1781_v20  ;;  %v530_v6 = vrot.slane %v384_v62, %v1775_v18  ;;  %v551_v12 = vrot.slane %v384_v62, %v1778_v19  ;;  %s1509_s29 = sld [smem:[#allocation2 + $0x82]] }
  0x49   : > { %v544_v13 = vrot.slane %v384_v62, %v1772_v17  ;;  %v565_v16 = vrot.slane %v384_v62, %v1788_v28  ;;  %v558_v21 = vrot.slane %v384_v62, %v1794_v32  ;;  %v406_v2 = vadd.f32 %v405_v11, %v398_v14 }
  0x4a   : > { %v579_v4 = vrot.slane %v384_v62, %v1799_v36  ;;  %v572_v22 = vrot.slane %v384_v62, %v1803_v38 }
  0x4b   : > { %v414_v23 = vadd.f32 %v413_v1, %v406_v2 }
  0x4c   : > { %469 = vbcast.lane.b32.xlu1 %v467_v41, 256  ;;  %462 = vbcast.lane.b32.xlu0 %v460_v42, 256 }
  0x4d   : > { %v593_v24 = vrot.slane %v414_v23, %v1781_v20  ;;  %v586_v7 = vrot.slane %v414_v23, %v1775_v18  ;;  %v607_v25 = vrot.slane %v414_v23, %v1778_v19  ;;  %v600_v26 = vrot.slane %v414_v23, %v1772_v17 }
  0x4e   : > { %v621_v27 = vrot.slane %v414_v23, %v1788_v28  ;;  %v614_v29 = vrot.slane %v414_v23, %v1794_v32  ;;  %v635_v30 = vrot.slane %v414_v23, %v1799_v36  ;;  %v628_v20 = vrot.slane %v414_v23, %v1803_v38 }
  0x4f   : > { %v1653_v18 = vmov 1983009808   ;;  %v1654_v17 = vmov 1934713408  }
  0x50   : > { %483 = vbcast.lane.b32.xlu1 %v481_v47, 256  ;;  %476 = vbcast.lane.b32.xlu0 %v474_v48, 256  ;;  %v642_v31 = vunpack.c.l.s4 %v1653_v18  ;;  %v706_v34 = vunpack.c.l.s4 %v1654_v17 }
  0x52   : > { %v643_v33 = vunpack.c.0.s8 %v642_v31  ;;  %v707_v32 = vunpack.c.0.s8 %v706_v34 }
  0x54   : > { %497 = vbcast.lane.b32.xlu1 %v495_v52, 256  ;;  %490 = vbcast.lane.b32.xlu0 %v488_v53, 256  ;;  %v1841_v19 = vsub.s32 %v643_v33, %v1765_v9  ;;  %v1845_v38 = vsub.s32 %v707_v32, %v1765_v9 }
  0x58   : > { %511 = vbcast.lane.b32.xlu1 %v509_v57, 256  ;;  %504 = vbcast.lane.b32.xlu0 %v502_v58, 256 }
  0x5c   : > { %525 = vbcast.lane.b32.xlu1 %v523_v60, 256  ;;  %518 = vbcast.lane.b32.xlu0 %v516_v61, 256 }
  0x60   : > { %539 = vbcast.lane.b32.xlu1 %v537_v5, 256  ;;  %532 = vbcast.lane.b32.xlu0 %v530_v6, 256 }
  0x64   : > { %553 = vbcast.lane.b32.xlu1 %v551_v12, 256  ;;  %546 = vbcast.lane.b32.xlu0 %v544_v13, 256 }
  0x68   : > { %567 = vbcast.lane.b32.xlu1 %v565_v16, 256  ;;  %560 = vbcast.lane.b32.xlu0 %v558_v21, 256 }
  0x6c   : > { %581 = vbcast.lane.b32.xlu1 %v579_v4, 256  ;;  %574 = vbcast.lane.b32.xlu0 %v572_v22, 256 }
  0x70   : > { %595 = vbcast.lane.b32.xlu1 %v593_v24, 256  ;;  %588 = vbcast.lane.b32.xlu0 %v586_v7, 256 }
  0x74   : > { %609 = vbcast.lane.b32.xlu1 %v607_v25, 256  ;;  %602 = vbcast.lane.b32.xlu0 %v600_v26, 256 }
  0x78   : > { %623 = vbcast.lane.b32.xlu1 %v621_v27, 256  ;;  %616 = vbcast.lane.b32.xlu0 %v614_v29, 256 }
  0x7c   : > { %637 = vbcast.lane.b32.xlu1 %v635_v30, 256  ;;  %630 = vbcast.lane.b32.xlu0 %v628_v20, 256 }
  0xb2   : > { %v435_v35 = vpop.permute.xlu1 %434  ;;  %v421_v28 = vpop.permute.xlu0 %420 }
  0xb3   : > { %v640_v37 = vcombine.high %v421_v28, %v435_v35  ;;  %v639_v48 = vcombine.low %v421_v28, %v435_v35 }
  0xb5   : > { %v654_v39 = vrot.slane %v640_v37, %v1841_v19  ;;  %v1858_v57 = vrot.slane %v639_v48, %v1841_v19 }
  0xb6   : > { %v442_v40 = vpop.permute.xlu1 %441  ;;  %v428_v36 = vpop.permute.xlu0 %427 }
  0xb7   : > { %v656_v41 = vcombine.high %v428_v36, %v442_v40  ;;  %v655_v43 = vcombine.low %v428_v36, %v442_v40 }
  0xb9   : > { %v670_v42 = vrot.slane %v656_v41, %v1841_v19  ;;  %v1855_v51 = vrot.slane %v655_v43, %v1841_v19 }
  0xba   : > { %v456_v44 = vpop.permute.xlu1 %455  ;;  %v449_v45 = vpop.permute.xlu0 %448 }
  0xbb   : > { %v719_v46 = vcombine.low %v654_v39, %v670_v42  ;;  %v720_v47 = vcombine.high %v654_v39, %v670_v42  ;;  %v703_v62 = vcombine.low %v1858_v57, %v1855_v51 }
  0xbd   : > { %v1849_v49 = vrot.slane %v719_v46, %v1845_v38  ;;  %v1852_v50 = vrot.slane %v720_v47, %v1845_v38  ;;  %v1882_v14 = vrot.slane %v703_v62, %v1845_v38 }
  0xbe   : > { %v470_v52 = vpop.permute.xlu1 %469  ;;  %v463_v9 = vpop.permute.xlu0 %462 }
  0xbf   : > { %v687_v53 = vcombine.low %v456_v44, %v470_v52  ;;  %v688_v54 = vcombine.high %v456_v44, %v470_v52  ;;  %v671_v55 = vcombine.low %v449_v45, %v463_v9  ;;  %v672_v56 = vcombine.high %v449_v45, %v463_v9 }
  0xc1   : > { %v1861_v58 = vrot.slane %v687_v53, %v1841_v19  ;;  %v702_v59 = vrot.slane %v688_v54, %v1841_v19  ;;  %v1865_v60 = vrot.slane %v671_v55, %v1841_v19  ;;  %v686_v61 = vrot.slane %v672_v56, %v1841_v19 }
  0xc2   : > { %v484_v63 = vpop.permute.xlu1 %483  ;;  %v477_v0 = vpop.permute.xlu0 %476 }
  0xc3   : > { %v735_v3 = vcombine.low %v1865_v60, %v1861_v58  ;;  %v751_v5 = vcombine.low %v686_v61, %v702_v59  ;;  %v752_v6 = vcombine.high %v686_v61, %v702_v59 }
  0xc5   : > { %v1873_v8 = vrot.slane %v735_v3, %v1845_v38  ;;  %v1876_v10 = vrot.slane %v751_v5, %v1845_v38  ;;  %v1879_v11 = vrot.slane %v752_v6, %v1845_v38 }
  0xc6   : > { %v498_v12 = vpop.permute.xlu1 %497  ;;  %v491_v13 = vpop.permute.xlu0 %490 }
  0xc7   : > { %v792_v15 = vcombine.high %v484_v63, %v498_v12  ;;  %v776_v1 = vcombine.high %v477_v0, %v491_v13  ;;  %v768_v16 = vcombine.high %v1882_v14, %v1873_v8  ;;  %v771_v21 = vcombine.low %v1849_v49, %v1876_v10 }
  0xc8   : > { %v791_v2 = vcombine.low %v484_v63, %v498_v12  ;;  %v775_v22 = vcombine.low %v477_v0, %v491_v13  ;;  %v772_v25 = vcombine.high %v1849_v49, %v1876_v10  ;;  %v773_v26 = vcombine.low %v1852_v50, %v1879_v11 }
  0xc9   : > { %v806_v4 = vrot.slane %v792_v15, %v1841_v19  ;;  %v790_v23 = vrot.slane %v776_v1, %v1841_v19  ;;  %1187 = vrot.lane.b32.xlu0 %v768_v16, %s1655_s30  ;;  %v774_v27 = vcombine.high %v1852_v50, %v1879_v11  ;;  %v767_v29 = vcombine.low %v1882_v14, %v1873_v8 }
  0xca   : > { %v512_v24 = vpop.permute.xlu1 %511  ;;  %v505_v7 = vpop.permute.xlu0 %504  ;;  %v1906_v33 = vrot.slane %v791_v2, %v1841_v19  ;;  %v1909_v17 = vrot.slane %v775_v22, %v1841_v19 }
  0xcb   : > { %v855_v30 = vcombine.low %v790_v23, %v806_v4  ;;  %v856_v20 = vcombine.high %v790_v23, %v806_v4 }
  0xcc   : > { %v839_v43 = vcombine.low %v1909_v17, %v1906_v33 }
  0xcd   : > { %v1900_v18 = vrot.slane %v855_v30, %v1845_v38  ;;  %v1903_v31 = vrot.slane %v856_v20, %v1845_v38 }
  0xce   : > { %v526_v34 = vpop.permute.xlu1 %525  ;;  %v519_v35 = vpop.permute.xlu0 %518  ;;  %v1933_v56 = vrot.slane %v839_v43, %v1845_v38 }
  0xcf   : > { %v823_v28 = vcombine.low %v512_v24, %v526_v34  ;;  %v824_v37 = vcombine.high %v512_v24, %v526_v34  ;;  %v807_v32 = vcombine.low %v505_v7, %v519_v35  ;;  %v808_v39 = vcombine.high %v505_v7, %v519_v35 }
  0xd1   : > { %v1912_v40 = vrot.slane %v823_v28, %v1841_v19  ;;  %v838_v36 = vrot.slane %v824_v37, %v1841_v19  ;;  %v1916_v41 = vrot.slane %v807_v32, %v1841_v19  ;;  %v822_v42 = vrot.slane %v808_v39, %v1841_v19 }
  0xd2   : > { %v540_v44 = vpop.permute.xlu1 %539  ;;  %v533_v45 = vpop.permute.xlu0 %532 }
  0xd3   : > { %v871_v46 = vcombine.low %v1916_v41, %v1912_v40  ;;  %v887_v47 = vcombine.low %v822_v42, %v838_v36  ;;  %v888_v48 = vcombine.high %v822_v42, %v838_v36 }
  0xd5   : > { %v1924_v52 = vrot.slane %v871_v46, %v1845_v38  ;;  %v1927_v9 = vrot.slane %v887_v47, %v1845_v38  ;;  %v1930_v53 = vrot.slane %v888_v48, %v1845_v38  ;;  %v704_v48 = vcombine.high %v1858_v57, %v1855_v51 }
  0xd6   : > { %v554_v54 = vpop.permute.xlu1 %553  ;;  %v547_v55 = vpop.permute.xlu0 %546 }
  0xd7   : > { %v928_v59 = vcombine.high %v540_v44, %v554_v54  ;;  %v912_v61 = vcombine.high %v533_v45, %v547_v55  ;;  %v904_v62 = vcombine.high %v1933_v56, %v1924_v52  ;;  %v907_v63 = vcombine.low %v1900_v18, %v1927_v9 }
  0xd8   : > { %v927_v0 = vcombine.low %v540_v44, %v554_v54  ;;  %v911_v5 = vcombine.low %v533_v45, %v547_v55  ;;  %v908_v15 = vcombine.high %v1900_v18, %v1927_v9  ;;  %v909_v1 = vcombine.low %v1903_v31, %v1930_v53 }
  0xd9   : > { %v1940_v3 = vrot.slane %v928_v59, %v1841_v19  ;;  %v1943_v6 = vrot.slane %v912_v61, %v1841_v19  ;;  %1189 = vrot.lane.b32.xlu1 %v904_v62, %s1655_s30  ;;  %v910_v16 = vcombine.high %v1903_v31, %v1930_v53  ;;  %v903_v2 = vcombine.low %v1933_v56, %v1924_v52 }
  0xda   : > { %v568_v12 = vpop.permute.xlu1 %567  ;;  %v561_v13 = vpop.permute.xlu0 %560  ;;  %v935_v23 = vrot.slane %v927_v0, %v1841_v19  ;;  %v919_v24 = vrot.slane %v911_v5, %v1841_v19  ;;  %v736_v45 = vcombine.high %v1865_v60, %v1861_v58 }
  0xdb   : > { %v992_v4 = vcombine.high %v1943_v6, %v1940_v3 }
  0xdc   : > { %v975_v42 = vcombine.low %v919_v24, %v935_v23  ;;  %v750_v60 = vrot.slane %v736_v45, %v1845_v38 }
  0xdd   : > { %v1957_v22 = vrot.slane %v992_v4, %v1845_v38 }
  0xde   : > { %v582_v7 = vpop.permute.xlu1 %581  ;;  %v575_v30 = vpop.permute.xlu0 %574  ;;  %v1982_v62 = vrot.slane %v975_v42, %v1845_v38 }
  0xdf   : > { %v959_v20 = vcombine.low %v568_v12, %v582_v7  ;;  %v960_v34 = vcombine.high %v568_v12, %v582_v7  ;;  %v943_v35 = vcombine.low %v561_v13, %v575_v30  ;;  %v944_v28 = vcombine.high %v561_v13, %v575_v30 }
  0xe0   : > { %v718_v7 = vrot.slane %v704_v48, %v1845_v38  ;;  %v976_v30 = vcombine.high %v919_v24, %v935_v23 }
  0xe1   : > { %v967_v37 = vrot.slane %v959_v20, %v1841_v19  ;;  %v1963_v32 = vrot.slane %v960_v34, %v1841_v19  ;;  %v951_v39 = vrot.slane %v943_v35, %v1841_v19  ;;  %v1967_v36 = vrot.slane %v944_v28, %v1841_v19 }
  0xe2   : > { %v596_v43 = vpop.permute.xlu1 %595  ;;  %v589_v44 = vpop.permute.xlu0 %588  ;;  %v769_v23 = vcombine.low %v718_v7, %v750_v60 }
  0xe3   : > { %v1007_v46 = vcombine.low %v951_v39, %v967_v37  ;;  %v1024_v47 = vcombine.high %v1967_v36, %v1963_v32  ;;  %v1008_v5 = vcombine.high %v951_v39, %v967_v37 }
  0xe5   : > { %v1976_v54 = vrot.slane %v1007_v46, %v1845_v38  ;;  %v1979_v55 = vrot.slane %v1024_v47, %v1845_v38  ;;  %v1022_v24 = vrot.slane %v1008_v5, %v1845_v38 }
  0xe6   : > { %v610_v59 = vpop.permute.xlu1 %609  ;;  %v603_v61 = vpop.permute.xlu0 %602 }
  0xe7   : > { %v1064_v0 = vcombine.high %v596_v43, %v610_v59  ;;  %v1048_v58 = vcombine.high %v589_v44, %v603_v61  ;;  %v1063_v12 = vcombine.low %v596_v43, %v610_v59  ;;  %v1047_v13 = vcombine.low %v589_v44, %v603_v61 }
  0xe8   : > { %v1040_v51 = vcombine.high %v1982_v62, %v1976_v54  ;;  %v1045_v35 = vcombine.low %v1957_v22, %v1979_v55  ;;  %v1046_v28 = vcombine.high %v1957_v22, %v1979_v55  ;;  %v1039_v37 = vcombine.low %v1982_v62, %v1976_v54 }
  0xe9   : > { %v1078_v57 = vrot.slane %v1064_v0, %v1841_v19  ;;  %v1062_v4 = vrot.slane %v1048_v58, %v1841_v19  ;;  %v1071_v43 = vrot.slane %v1063_v12, %v1841_v19  ;;  %v1055_v44 = vrot.slane %v1047_v13, %v1841_v19 }
  0xea   : > { %1191 = vrot.lane.b32.xlu0 %v1040_v51, %s1655_s30  ;;  %v624_v20 = vpop.permute.xlu1 %623  ;;  %v617_v34 = vpop.permute.xlu0 %616  ;;  %v990_v59 = vrot.slane %v976_v30, %v1845_v38 }
  0xeb   : > { %v1127_v39 = vcombine.low %v1062_v4, %v1078_v57  ;;  %v1128_v42 = vcombine.high %v1062_v4, %v1078_v57  ;;  %v1111_v13 = vcombine.low %v1055_v44, %v1071_v43 }
  0xec   : > { %v1041_v51 = vcombine.low %v990_v59, %v1022_v24 }
  0xed   : > { %v2001_v45 = vrot.slane %v1127_v39, %v1845_v38  ;;  %v2004_v46 = vrot.slane %v1128_v42, %v1845_v38  ;;  %v872_v42 = vcombine.high %v1916_v41, %v1912_v40  ;;  %v1023_v40 = vcombine.low %v1967_v36, %v1963_v32 }
  0xee   : > { %1203 = vrot.lane.b32.xlu0 %v769_v23, %s1656_s5  ;;  %v638_v47 = vpop.permute.xlu1 %637  ;;  %v631_v48 = vpop.permute.xlu0 %630  ;;  %v1112_v36 = vcombine.high %v1055_v44, %v1071_v43 }
  0xef   : > { %v1095_v61 = vcombine.low %v624_v20, %v638_v47  ;;  %v1096_v0 = vcombine.high %v624_v20, %v638_v47  ;;  %v1079_v58 = vcombine.low %v617_v34, %v631_v48  ;;  %v1080_v12 = vcombine.high %v617_v34, %v631_v48 }
  0xf0   : > { %v840_v34 = vcombine.high %v1909_v17, %v1906_v33  ;;  %v770_v47 = vcombine.high %v718_v7, %v750_v60  ;;  %v2018_v48 = vrot.slane %v1111_v13, %v1845_v38  ;;  %v886_v41 = vrot.slane %v872_v42, %v1845_v38 }
  0xf1   : > { %v1103_v5 = vrot.slane %v1095_v61, %v1841_v19  ;;  %v1110_v57 = vrot.slane %v1096_v0, %v1841_v19  ;;  %v1087_v4 = vrot.slane %v1079_v58, %v1841_v19  ;;  %v1094_v39 = vrot.slane %v1080_v12, %v1841_v19 }
  0xf2   : > { %1207 = vrot.lane.b32.xlu0 %v1041_v51, %s1656_s5  ;;  %v1042_v17 = vcombine.high %v990_v59, %v1022_v24  ;;  %v854_v51 = vrot.slane %v840_v34, %v1845_v38  ;;  %v991_v24 = vcombine.low %v1943_v6, %v1940_v3 }
  0xf3   : > { %v1143_v30 = vcombine.low %v1087_v4, %v1103_v5  ;;  %v1159_v23 = vcombine.low %v1094_v39, %v1110_v57  ;;  %v1160_v20 = vcombine.high %v1094_v39, %v1110_v57  ;;  %v1144_v33 = vcombine.high %v1087_v4, %v1103_v5 }
  0xf4   : > { %v905_v59 = vcombine.low %v854_v51, %v886_v41  ;;  %v1031_v5 = vrot.slane %v1023_v40, %v1845_v38  ;;  %v999_v43 = vrot.slane %v991_v24, %v1845_v38  ;;  %v906_v6 = vcombine.high %v854_v51, %v886_v41 }
  0xf5   : > { %v2021_v61 = vrot.slane %v1143_v30, %v1845_v38  ;;  %v1167_v19 = vrot.slane %v1159_v23, %v1845_v38  ;;  %v1174_v0 = vrot.slane %v1160_v20, %v1845_v38 }
  0xf6   : > { %1219 = vrot.lane.b32.xlu0 %v770_v47, %s1657_s6  ;;  %v1043_v3 = vcombine.low %v999_v43, %v1031_v5  ;;  %v1044_v4 = vcombine.high %v999_v43, %v1031_v5  ;;  %v296_v5 = vstv %s295_s13  ;;  %v287_v43 = vld [vmem:[%s270_s22] sm:$0xff] }
  0xf7   : > { %v1176_v60 = vcombine.high %v2018_v48, %v2021_v61  ;;  %v1179_v7 = vcombine.low %v2001_v45, %v1167_v19  ;;  %v1180_v58 = vcombine.high %v2001_v45, %v1167_v19  ;;  %v1181_v12 = vcombine.low %v2004_v46, %v1174_v0 }
  0xf8   : > { %v1182_v13 = vcombine.high %v2004_v46, %v1174_v0  ;;  %v1175_v32 = vcombine.low %v2018_v48, %v2021_v61  ;;  %v1158_v45 = vrot.slane %v1144_v33, %v1845_v38  ;;  %v1126_v46 = vrot.slane %v1112_v36, %v1845_v38 }
  0xf9   : > { %1193 = vrot.lane.b32.xlu1 %v1176_v60, %s1655_s30  ;;  %s1521_s30 = sld [smem:[#allocation2 + $0x180]] }
  0xfa   : > { %1223 = vrot.lane.b32.xlu0 %v1042_v17, %s1657_s6  ;;  %v1177_v44 = vcombine.low %v1126_v46, %v1158_v45  ;;  %v1178_v57 = vcombine.high %v1126_v46, %v1158_v45  ;;  %v302_v46 = vstv %s1499_s14 }
  0xfd   : > { %1205 = vrot.lane.b32.xlu1 %v905_v59, %s1656_s5 }
  0xfe   : > { %1235 = vrot.lane.b32.xlu0 %v771_v21, %s1658_s7 }
 0x101   : > { %1209 = vrot.lane.b32.xlu1 %v1177_v44, %s1656_s5  ;;  %v288_v44 = vld [vmem:[%s270_s22 + $0x8] sm:$0xff]  ;;  %s1523_s5 = sld [smem:[#allocation2 + $0x181]] }
 0x102   : > { %1239 = vrot.lane.b32.xlu0 %v1043_v3, %s1658_s7  ;;  %v297_v3 = vmul.f32 %v296_v5, %v287_v43 }
 0x105   : > { %1221 = vrot.lane.b32.xlu1 %v906_v6, %s1657_s6  ;;  %v303_v6 = vmul.f32 %v302_v46, %v288_v44 }
 0x106   : > { %1251 = vrot.lane.b32.xlu0 %v772_v25, %s1659_s8 }
 0x109   : > { %1225 = vrot.lane.b32.xlu1 %v1178_v57, %s1657_s6  ;;  %v310_v57 = vstv %s1501_s18  ;;  %s1511_s6 = sld [smem:[#allocation2 + $0x83]] }
 0x10a   : > { %1255 = vrot.lane.b32.xlu0 %v1044_v4, %s1659_s8  ;;  %v289_v4 = vld [vmem:[%s270_s22 + $0x10] sm:$0xff] }
 0x10d   : > { %1237 = vrot.lane.b32.xlu1 %v907_v63, %s1658_s7 }
 0x10e   : > { %1267 = vrot.lane.b32.xlu0 %v773_v26, %s1660_s9 }
 0x111   : > { %1241 = vrot.lane.b32.xlu1 %v1179_v7, %s1658_s7  ;;  %s1525_s7 = sld [smem:[#allocation2 + $0x182]] }
 0x112   : > { %1271 = vrot.lane.b32.xlu0 %v1045_v35, %s1660_s9 }
 0x115   : > { %1253 = vrot.lane.b32.xlu1 %v908_v15, %s1659_s8 }
 0x116   : > { %1283 = vrot.lane.b32.xlu0 %v774_v27, %s1661_s11 }
 0x119   : > { %1257 = vrot.lane.b32.xlu1 %v1180_v58, %s1659_s8 }
 0x11a   : > { %1287 = vrot.lane.b32.xlu0 %v1046_v28, %s1661_s11 }
 0x11d   : > { %1269 = vrot.lane.b32.xlu1 %v909_v1, %s1660_s9 }
 0x121   : > { %1273 = vrot.lane.b32.xlu1 %v1181_v12, %s1660_s9 }
 0x125   : > { %1285 = vrot.lane.b32.xlu1 %v910_v16, %s1661_s11 }
 0x129   : > { %1289 = vrot.lane.b32.xlu1 %v1182_v13, %s1661_s11  ;;  %s2140_s11 = scalar_lea.vmem %s2171_s4, %s1749_s10 }
 0x13b   : > { %v1188_v38 = vpop.permute.xlu0 %1187 }
 0x13c   : > { %v1296_v53 = vsel %vm1295_vm0, %v767_v29, %v1188_v38  ;;  %v356_v38 = vstv %s1513_s15 }
 0x14b   : > { %v1190_v11 = vpop.permute.xlu1 %1189 }
 0x14c   : > { %v1297_v17 = vsel %vm1295_vm0, %v903_v2, %v1190_v11  ;;  %v318_v11 = vstv %s1503_s24 }
 0x15c   : > { %v1192_v49 = vpop.permute.xlu0 %1191 }
 0x15d   : > { %v1298_v23 = vsel %vm1295_vm0, %v1039_v37, %v1192_v49  ;;  %v362_v49 = vstv %s1515_s23 }
 0x160   : > { %v1204_v10 = vpop.permute.xlu0 %1203 }
 0x161   : > { %v1301_v28 = vsel %vm1300_vm1, %v1296_v53, %v1204_v10  ;;  %v304_v10 = vadd.f32 %v303_v6, %v297_v3  ;;  %v332_v53 = vstv %s1507_s28 }
 0x164   : > { %v1208_v50 = vpop.permute.xlu0 %1207 }
 0x165   : > { %v1303_v29 = vsel %vm1300_vm1, %v1298_v23, %v1208_v50  ;;  %v311_v50 = vmul.f32 %v310_v57, %v289_v4 }
 0x168   : > { %v1220_v21 = vpop.permute.xlu0 %1219 }
 0x169   : > { %v1306_v42 = vsel %vm1305_vm2, %v1301_v28, %v1220_v21  ;;  %v290_v21 = vld [vmem:[%s270_s22 + $0x18] sm:$0xff] }
 0x16b   : > { %v1194_v25 = vpop.permute.xlu1 %1193 }
 0x16c   : > { %v1224_v26 = vpop.permute.xlu0 %1223  ;;  %v1299_v13 = vsel %vm1295_vm0, %v1175_v32, %v1194_v25  ;;  %v357_v25 = vmul.f32 %v356_v38, %v287_v43 }
 0x16d   : > { %v1308_v47 = vsel %vm1305_vm2, %v1303_v29, %v1224_v26  ;;  %v363_v26 = vmul.f32 %v362_v49, %v288_v44  ;;  %v392_v29 = vstv %s1523_s5 }
 0x16f   : > { %v1206_v27 = vpop.permute.xlu1 %1205 }
 0x170   : > { %v1236_v18 = vpop.permute.xlu0 %1235  ;;  %v1302_v60 = vsel %vm1300_vm1, %v1297_v17, %v1206_v27  ;;  %v370_v27 = vstv %s1517_s25 }
 0x171   : > { %v1311_v30 = vsel %vm1310_vm3, %v1306_v42, %v1236_v18  ;;  %v312_v18 = vadd.f32 %v311_v50, %v304_v10 }
 0x173   : > { %v1210_v9 = vpop.permute.xlu1 %1209 }
 0x174   : > { %v1240_v63 = vpop.permute.xlu0 %1239  ;;  %v1304_v51 = vsel %vm1300_vm1, %v1299_v13, %v1210_v9  ;;  %v319_v9 = vmul.f32 %v318_v11, %v290_v21 }
 0x175   : > { %v1313_v0 = vsel %vm1310_vm3, %v1308_v47, %v1240_v63  ;;  %v364_v63 = vadd.f32 %v363_v26, %v357_v25 }
 0x177   : > { %v1222_v15 = vpop.permute.xlu1 %1221 }
 0x178   : > { %v1252_v1 = vpop.permute.xlu0 %1251  ;;  %v1307_v58 = vsel %vm1305_vm2, %v1302_v60, %v1222_v15  ;;  %v371_v15 = vmul.f32 %v370_v27, %v289_v4 }
 0x179   : > { %v1316_v8 = vsel %vm1315_vm4, %v1311_v30, %v1252_v1  ;;  %v378_v1 = vstv %s1519_s26  ;;  %v333_v30 = vmul.f32 %v332_v53, %v288_v44 }
 0x17b   : > { %v1226_v22 = vpop.permute.xlu1 %1225 }
 0x17c   : > { %v1256_v55 = vpop.permute.xlu0 %1255  ;;  %v1309_v2 = vsel %vm1305_vm2, %v1304_v51, %v1226_v22  ;;  %v320_v22 = vadd.f32 %v319_v9, %v312_v18 }
 0x17d   : > { %v1318_v54 = vsel %vm1315_vm4, %v1313_v0, %v1256_v55  ;;  %v372_v55 = vadd.f32 %v371_v15, %v364_v63 }
 0x17f   : > { %v1238_v35 = vpop.permute.xlu1 %1237 }
 0x180   : > { %v1268_v31 = vpop.permute.xlu0 %1267  ;;  %v1312_v12 = vsel %vm1310_vm3, %v1307_v58, %v1238_v35  ;;  %v379_v35 = vmul.f32 %v378_v1, %v290_v21 }
 0x181   : > { %v1321_v20 = vsel %vm1320_vm5, %v1316_v8, %v1268_v31  ;;  %v326_v31 = vstv %s1505_s27 }
 0x182   : > { %v327_v42 = vmul.f32 %v326_v31, %v287_v43  ;;  %v380_v8 = vadd.f32 %v379_v35, %v372_v55 }
 0x183   : > { %v1242_v16 = vpop.permute.xlu1 %1241 }
 0x184   : > { %v1272_v39 = vpop.permute.xlu0 %1271  ;;  %v1314_v59 = vsel %vm1310_vm3, %v1309_v2, %v1242_v16  ;;  %v334_v0 = vadd.f32 %v333_v30, %v327_v42 }
 0x185   : > { %v1323_v37 = vsel %vm1320_vm5, %v1318_v54, %v1272_v39  ;;  %v340_v39 = vstv %s1509_s29 }
 0x187   : > { %v1254_v14 = vpop.permute.xlu1 %1253 }
 0x188   : > { %v1284_v34 = vpop.permute.xlu0 %1283  ;;  %v1317_v36 = vsel %vm1315_vm4, %v1312_v12, %v1254_v14  ;;  %v386_v14 = vstv %s1521_s30 }
 0x189   : > { %v2096_v19 = vsel %vm1325_vm6, %v1321_v20, %v1284_v34  ;;  %v341_v34 = vmul.f32 %v340_v39, %v289_v4  ;;  %v387_v54 = vmul.f32 %v386_v14, %v287_v43 }
 0x18a   : > { %1334 = vrot.lane.b32.xlu0 %v2096_v19, %s1662_s12 }
 0x18b   : > { %v1258_v62 = vpop.permute.xlu1 %1257 }
 0x18c   : > { %v1288_v40 = vpop.permute.xlu0 %1287  ;;  %v1319_v48 = vsel %vm1315_vm4, %v1314_v59, %v1258_v62  ;;  %v393_v62 = vmul.f32 %v392_v29, %v288_v44 }
 0x18d   : > { %v2103_v41 = vsel %vm1325_vm6, %v1323_v37, %v1288_v40  ;;  %v348_v37 = vstv %s1511_s6  ;;  %v400_v40 = vstv %s1525_s7 }
 0x18e   : > { %1338 = vrot.lane.b32.xlu0 %v2103_v41, %s1662_s12  ;;  %v349_v17 = vmul.f32 %v348_v37, %v290_v21  ;;  %v394_v60 = vadd.f32 %v393_v62, %v387_v54 }
 0x18f   : > { %v1270_v33 = vpop.permute.xlu1 %1269 }
 0x190   : > { %v1322_v52 = vsel %vm1320_vm5, %v1317_v36, %v1270_v33  ;;  %v342_v33 = vadd.f32 %v341_v34, %v334_v0 }
 0x192   : > { %v350_v12 = vadd.f32 %v349_v17, %v342_v33 }
 0x193   : > { %v1274_v7 = vpop.permute.xlu1 %1273 }
 0x194   : > { %v1324_v61 = vsel %vm1320_vm5, %v1319_v48, %v1274_v7  ;;  %v401_v7 = vmul.f32 %v400_v40, %v289_v4 }
 0x196   : > { %v402_v13 = vadd.f32 %v401_v7, %v394_v60 }
 0x197   : > { %v1286_v56 = vpop.permute.xlu1 %1285 }
 0x198   : > { %v2122_v24 = vsel %vm1325_vm6, %v1322_v52, %v1286_v56 }
 0x199   : > { %1336 = vrot.lane.b32.xlu1 %v2122_v24, %s1662_s12 }
 0x19b   : > { %v1290_v32 = vpop.permute.xlu1 %1289 }
 0x19c   : > { %v2129_v45 = vsel %vm1325_vm6, %v1324_v61, %v1290_v32 }
 0x19d   : > { %1340 = vrot.lane.b32.xlu1 %v2129_v45, %s1662_s12  ;;  %s1527_s12 = sld [smem:[#allocation2 + $0x183]] }
 0x1a3   : > { %v408_v58 = vstv %s1527_s12 }
 0x1a4   : > { %v409_v36 = vmul.f32 %v408_v58, %v290_v21 }
 0x1a6   : > { %v410_v56 = vadd.f32 %v409_v36, %v402_v13 }
 0x1fc   : > { %v1335_v16 = vpop.permute.xlu0 %1334 }
 0x1fd   : > { %v1347_v28 = vsel %vm1346_vm7, %v2096_v19, %v1335_v16 }
 0x1fe   : > { %v1351_v23 = vadd.f32 %v1347_v28, %v320_v22 }
 0x200   : > { %1356 = vst.msk [vmem:[%s2140_s11] sm:$0xff] %vm1355_vm8, %v1351_v23  ;;  %v1339_v20 = vpop.permute.xlu0 %1338 }
 0x201   : > { %v1349_v47 = vsel %vm1346_vm7, %v2103_v41, %v1339_v20 }
 0x202   : > { %v1353_v19 = vadd.f32 %v1349_v47, %v380_v8 }
 0x204   : > { %1358 = vst.msk [vmem:[%s2140_s11 + $0x10] sm:$0xff] %vm1355_vm8, %v1353_v19 }
 0x20b   : > { %v1337_v51 = vpop.permute.xlu1 %1336 }
 0x20c   : > { %v1348_v41 = vsel %vm1346_vm7, %v2122_v24, %v1337_v51 }
 0x20d   : > { %v1352_v52 = vadd.f32 %v1348_v41, %v350_v12 }
 0x20f   : > { %1357 = vst.msk [vmem:[%s2140_s11 + $0x8] sm:$0xff] %vm1355_vm8, %v1352_v52  ;;  %v1341_v2 = vpop.permute.xlu1 %1340 }
 0x210   : > { %v1350_v59 = vsel %vm1346_vm7, %v2129_v45, %v1341_v2 }
 0x211   : > { %v1354_v48 = vadd.f32 %v1350_v59, %v410_v56 }
 0x213   : > { %1359 = vst.msk [vmem:[%s2140_s11 + $0x18] sm:$0xff] %vm1355_vm8, %v1354_v48 }
 0x214 PF: > { %s16_s17 = sadd.s32 1, %s1649_s17   ;;  %s2180_s15 = smov %s1645_s16 }
 0x215   : > { %p13_p4 = scmp.ge.s32.totalorder %s16_s17, 4   ;;  %s2181_s16 = smov %s2183_s19 }
 0x217   :  { %15 = sbr.rel (!%p13_p4) target bundleno = 3 (0x3), region = 78 }
 0x21c   :  { %1387 = vsyncpa [#allocation3], 1 }
 0x21d   :  { %1389 = vsyncpa [#allocation3 + $0x1], 1 }
 0x21e   :  { %1390 = vsyncpa [#allocation5], 1 }

</bundles_post_ra>
